<compile_context>
chip_gen: v5e
topology: v5e:2x2
jax: 0.10.0
libtpu: 0.0.40
codegen_flags: <defaults>
</compile_context>

<pallas_src>
import functools
import math
import random

import numpy as np
import jax
import jax.numpy as jnp
from jax import lax
from jax.experimental import pallas as pl
from jax.experimental.pallas import tpu as pltpu


# ----------------------------- Pallas kernel -------------------------------- #

def _patch_mask_kernel(patch_idx_smem, ch_idx_smem, patch_idx_vmem,
                       dense_ref, patch_dense_ref, ch_dense_ref,
                       *, nmasked, nmic, flat, b_tile, flatten):
    """One grid step = `b_tile` batch rows.

    patch_idx_smem : SMEM int32 (nbatch*max(nmasked,1),)   scalar prefetch (flat)
    ch_idx_smem    : SMEM int32 (nbatch,)                   scalar prefetch (flat)
    patch_idx_vmem : VMEM int32 (nbatch, 1, max(nmasked,1)) lane-dense indices
    *_dense_ref    : VMEM (b_tile, rows, cols); rows*cols == npatch*dpatch*nmic
    """
    pid = pl.program_id(0)
    _, rows, cols = dense_ref.shape
    out_dtype = dense_ref.dtype

    zero = jnp.float32(0.0)
    one = jnp.float32(1.0)

    # Hoisted iotas (shared by every batch row of this block).
    if flatten:
        # Fallback layout: one fully flattened lane row per batch element.
        pos = lax.broadcasted_iota(jnp.int32, (1, cols), 1)
        patch_of = pos // flat          # (1, cols) patch id of each position
        mic_of = pos % nmic             # (1, cols) mic id of each position
    else:
        mic_of = lax.broadcasted_iota(jnp.int32, (1, cols), 1) % nmic
        if nmasked > 0:
            # lane-dense membership: compare (npatch, nmasked) once + XLU reduce
            patch_ids = lax.broadcasted_iota(jnp.int32, (rows, nmasked), 0)

    def emit_row(t):
        b = pid * b_tile + t

        # --- patch membership -> keep mask (0 where masked) ---
        if nmasked == 0:
            patch_keep = jnp.ones((1, cols) if flatten else (rows, 1),
                                  jnp.float32)
        elif flatten:
            masked = patch_of == patch_idx_smem[b * nmasked]
            for j in range(1, nmasked):
                masked = jnp.logical_or(
                    masked, patch_of == patch_idx_smem[b * nmasked + j])
            patch_keep = jnp.where(masked, zero, one)            # (1, cols)
        else:
            idx_row = patch_idx_vmem[b]                          # (1, nmasked)
            hits = (patch_ids == idx_row).astype(jnp.float32)    # (rows, nmasked)
            patch_keep = one - jnp.max(hits, axis=1, keepdims=True)  # (rows, 1)

        mic_keep = jnp.where(mic_of == ch_idx_smem[b], zero, one)    # (1, cols)

        pd_row = jnp.broadcast_to(patch_keep, (rows, cols))
        cd_row = jnp.broadcast_to(mic_keep, (rows, cols))

        # mask_patch_dense[b, masked_patches, :, :] = 0
        patch_dense_ref[t] = pd_row.astype(out_dtype)
        # mask_ch_dense[b, :, :, masked_mic] = 0
        ch_dense_ref[t] = cd_row.astype(out_dtype)
        # mask_dense[b, masked_patches, :, masked_mic] = 0
        #   zero only where BOTH are masked -> elementwise max of the keeps.
        dense_ref[t] = jnp.maximum(pd_row, cd_row).astype(out_dtype)

    if b_tile <= 4:
        for t in range(b_tile):          # small static unroll
            emit_row(t)
    else:
        def body(t, carry):
            emit_row(t)
            return carry
        lax.fori_loop(0, b_tile, body, 0,
                      unroll=2 if b_tile % 2 == 0 else 1)


# --------------------------- host-side plumbing ------------------------------ #

_VMEM_SAFE_BUDGET = 48 << 20                     # < 64 MiB physical VMEM (v7x)
_TARGET_BLOCK_BYTES = min(4 << 20, _VMEM_SAFE_BUDGET // 6)   # 6x block <= budget


def _tensorcores_per_chip():
    """Best-effort TCs/chip: v7x has 2 (megacore grid sharding), else 1."""
    try:
        kind = (getattr(jax.devices()[0], "device_kind", "") or "").lower()
        if "v7" in kind:
            return 2
    except Exception:
        pass
    return 1


def _choose_b_tile(nbatch, row_bytes, target_block_bytes, prefer_even_grid):
    """Largest divisor of nbatch whose block fits the byte budget; on multi-TC
    chips prefer a tile giving an even number of grid steps (megacore balance)."""
    cap = max(1, min(nbatch, target_block_bytes // max(row_bytes, 1)))
    fits = [t for t in range(1, nbatch + 1) if nbatch % t == 0 and t <= cap] or [1]
    best = max(fits)
    if prefer_even_grid and (nbatch // best) % 2 != 0:
        even = [t for t in fits if (nbatch // t) % 2 == 0]
        if even:
            best = max(even)
    return best


@functools.lru_cache(maxsize=None)
def _build_mask_builder(nbatch, nmasked, npatch, dpatch, nmic, out_dtype_name):
    out_dtype = jnp.dtype(out_dtype_name)
    flat = dpatch * nmic
    # Lane-dense layout: the output's last dim should be a multiple of 128 for
    # unmasked full-lane stores / full-width writeback DMA.  Otherwise fall
    # back to one fully flattened lane row per batch element.
    flatten = (flat % 128) != 0
    rows, cols = (1, npatch * flat) if flatten else (npatch, flat)

    row_bytes = rows * cols * out_dtype.itemsize
    b_tile = _choose_b_tile(nbatch, row_bytes, _TARGET_BLOCK_BYTES,
                            prefer_even_grid=_tensorcores_per_chip() >= 2)
    block_bytes = b_tile * row_bytes
    # 3 outputs x 2 pipeline buffers x block + headroom; explicit limit so the
    # v5e 16 MiB scoped-VMEM default never constrains the block size.
    vmem_limit = int(min(56 << 20, max(24 << 20, 6 * block_bytes + (8 << 20))))

    grid = (nbatch // b_tile,)
    nmasked_in = max(nmasked, 1)

    out_sds = jax.ShapeDtypeStruct((nbatch, rows, cols), out_dtype)
    out_spec = pl.BlockSpec((b_tile, rows, cols), lambda i, *_: (i, 0, 0))
    idx_spec = pl.BlockSpec((nbatch, 1, nmasked_in), lambda i, *_: (0, 0, 0))

    kernel = functools.partial(_patch_mask_kernel, nmasked=nmasked, nmic=nmic,
                               flat=flat, b_tile=b_tile, flatten=flatten)

    call = pl.pallas_call(
        kernel,
        out_shape=(out_sds, out_sds, out_sds),
        grid_spec=pltpu.PrefetchScalarGridSpec(
            num_scalar_prefetch=2,
            grid=grid,
            in_specs=[idx_spec],
            out_specs=(out_spec, out_spec, out_spec),
        ),
        compiler_params=pltpu.CompilerParams(
            dimension_semantics=("parallel",),
            vmem_limit_bytes=vmem_limit),
    )
    # Trace/compile once per static config; only the tiny index arrays vary.
    return jax.jit(call)


def patch_mask_dense(mask_patch_idx, mask_ch_idx, npatch, dpatch, nmic,
                     out_dtype=jnp.float32):
    """Build the three dense masks on TPU from host-sampled indices."""
    mask_patch_idx = np.asarray(mask_patch_idx, dtype=np.int32)
    mask_ch_idx = np.asarray(mask_ch_idx, dtype=np.int32)
    nbatch, nmasked = mask_patch_idx.shape
    nmasked_in = max(nmasked, 1)
    patch_in = (mask_patch_idx if nmasked > 0
                else np.full((nbatch, 1), -1, dtype=np.int32))   # never matches

    fn = _build_mask_builder(nbatch, nmasked, npatch, dpatch, nmic,
                             jnp.dtype(out_dtype).name)
    dense, patch_dense, ch_dense = fn(
        jnp.asarray(patch_in.reshape(-1)),                # 1-D SMEM (no padding)
        jnp.asarray(mask_ch_idx.reshape(-1)),             # 1-D SMEM
        jnp.asarray(patch_in.reshape(nbatch, 1, nmasked_in)))  # VMEM, lane-dense

    # Split the flattened lane dim back to (..., dpatch, nmic): contiguous
    # trailing reshape -- layout plumbing only.
    shape4 = (nbatch, npatch, dpatch, nmic)
    return (dense.reshape(shape4), patch_dense.reshape(shape4),
            ch_dense.reshape(shape4))


# ------------------------ Host-side module replica --------------------------- #

class PatchMask:
    """JAX/Pallas port of the PyTorch PatchMask module.

    Random index sampling (Python `random`) stays on host, exactly mirroring
    the reference; dense mask construction runs in the Pallas kernel.
    `mask_dtype=jnp.bfloat16` is an optional ~2x writeback saving (values are
    exactly 0/1); default float32 matches the PyTorch module.
    """

    def __init__(self, patch_mode, nmasked_patch, npatch_shape,
                 mask_dtype=jnp.float32):
        self.patch_mode = patch_mode
        self.nmasked_patch = nmasked_patch
        self.npatch_shape = npatch_shape
        self.mask_dtype = mask_dtype

    # identical sampling logic to the PyTorch module (returns np.int32 array)
    def gen_mask_idx(self, npatch_shape=(16, 16), nmasked_patch=10, cluster=1,
                     patch_mode='TF'):
        npatch = npatch_shape[0] * npatch_shape[1]
        if nmasked_patch > npatch:
            raise Exception('Number of masked patches is out of range')
        if patch_mode == 'TF':
            mask_id = []
            cur_clus = random.randrange(cluster) + 3
            while len(list(set(mask_id))) <= nmasked_patch:
                start_id = random.randrange(npatch)
                cur_mask = []
                for i in range(0, cur_clus):
                    for j in range(0, cur_clus):
                        mask_cand = start_id + npatch_shape[1] * i + j
                        if 0 < mask_cand < npatch:
                            cur_mask.append(mask_cand)
                mask_id = mask_id + cur_mask
            mask_id = list(set(mask_id))[:nmasked_patch]
            return np.asarray(mask_id, dtype=np.int32)
        elif patch_mode == 'T':
            mask_id = random.sample(range(0, npatch), nmasked_patch)
            return np.asarray(mask_id, dtype=np.int32)
        elif patch_mode == 'T_cluster':
            mask_id = []
            cur_clus = random.randrange(cluster) + 5
            while len(list(set(mask_id))) <= nmasked_patch:
                start_id = random.randrange(npatch)
                cur_mask = []
                for i in range(0, cur_clus):
                    mask_cand = start_id + i
                    if 0 < mask_cand < npatch:
                        cur_mask.append(mask_cand)
                mask_id = mask_id + cur_mask
            mask_id = list(set(mask_id))[:nmasked_patch]
            return np.asarray(mask_id, dtype=np.int32)
        elif patch_mode == 'T_cluster2':
            clu_size = 5
            clu_start_id = random.sample(range(0, npatch, clu_size),
                                         math.ceil(nmasked_patch / clu_size) + 1)
            mask_id = []
            for clu_idx in range(len(clu_start_id)):
                for idx in range(clu_size):
                    mask_cand = clu_start_id[clu_idx] + idx
                    if 0 < mask_cand < npatch:
                        mask_id = mask_id + [mask_cand]
            mask_id = list(set(mask_id))[:nmasked_patch]
            return np.asarray(mask_id, dtype=np.int32)
        elif patch_mode == 'T_1s':
            return np.asarray(list(range(192, 256)), dtype=np.int32)
        else:
            # TODO(synk): 'T_cluster_inverse' returns a variable-length index
            # set; no fixed-shape kernel output -- not supported here.
            raise Exception('Patch mode is unrecognized')

    def __call__(self, data_shape):
        nbatch, npatch, dpatch, _, nmic = data_shape
        mask_patch_idx = np.empty((nbatch, self.nmasked_patch), dtype=np.int32)
        mask_ch_idx = np.empty((nbatch, 1), dtype=np.int32)
        for b_idx in range(nbatch):
            mask_patch_idx[b_idx, :] = self.gen_mask_idx(
                npatch_shape=self.npatch_shape,
                nmasked_patch=self.nmasked_patch,
                patch_mode=self.patch_mode)
            mask_ch_idx[b_idx, 0] = random.randint(0, nmic - 1)

        mask_dense, mask_patch_dense, mask_ch_dense = patch_mask_dense(
            mask_patch_idx, mask_ch_idx, npatch, dpatch, nmic,
            out_dtype=self.mask_dtype)
        return (mask_dense, mask_patch_dense, mask_ch_dense,
                jnp.asarray(mask_patch_idx), jnp.asarray(mask_ch_idx))


# ------------------------------- reference ----------------------------------- #

def _ref_masks(mask_patch_idx, mask_ch_idx, npatch, dpatch, nmic):
    nbatch = mask_patch_idx.shape[0]
    md = np.ones((nbatch, npatch, dpatch, nmic), dtype=np.float32)
    mp = np.ones_like(md)
    mc = np.ones_like(md)
    for b in range(nbatch):
        md[b, mask_patch_idx[b], :, mask_ch_idx[b, 0]] = 0
        mp[b, mask_patch_idx[b], :, :] = 0
        mc[b, :, :, mask_ch_idx[b, 0]] = 0
    return md, mp, mc


if __name__ == "__main__":
    # deterministic RNG: derive the python seed from PRNGKey(0)
    key = jax.random.PRNGKey(0)
    seed = int(jax.random.randint(key, (), 0, 2 ** 16))
    random.seed(seed)

    # small shapes: nbatch=2, npatch=16 (4x4 patch grid), dpatch=32, nmic=4
    # (dpatch*nmic = 128 -> lane-dense output layout)
    nbatch, npatch_shape, dpatch, nmic = 2, [4, 4], 32, 4
    npatch = npatch_shape[0] * npatch_shape[1]
    nmasked_patch = 5
    data_shape = (nbatch, npatch, dpatch, npatch, nmic)  # 4th entry is unused

    module = PatchMask(patch_mode='TF', nmasked_patch=nmasked_patch,
                       npatch_shape=npatch_shape)
    (mask_dense, mask_patch_dense, mask_ch_dense,
     mask_patch_idx, mask_ch_idx) = module(data_shape)

    jax.block_until_ready((mask_dense, mask_patch_dense, mask_ch_dense))

    # verify against a plain numpy reference of the PyTorch indexing semantics
    ref_d, ref_p, ref_c = _ref_masks(np.asarray(mask_patch_idx),
                                     np.asarray(mask_ch_idx),
                                     npatch, dpatch, nmic)
    np.testing.assert_allclose(np.asarray(mask_dense, dtype=np.float32), ref_d)
    np.testing.assert_allclose(np.asarray(mask_patch_dense, dtype=np.float32), ref_p)
    np.testing.assert_allclose(np.asarray(mask_ch_dense, dtype=np.float32), ref_c)

    print("KERNEL_OK")
</pallas_src>

<mosaic_0001>
module attributes {stable_mosaic.version = 11 : i64} {
  func.func @_patch_mask_kernel(%arg0: i32, %arg1: memref<10xi32, #tpu.memory_space<smem>>, %arg2: memref<2xi32, #tpu.memory_space<smem>>, %arg3: memref<2x1x5xi32, #tpu.memory_space<vmem>>, %arg4: memref<2x16x128xf32, #tpu.memory_space<vmem>>, %arg5: memref<2x16x128xf32, #tpu.memory_space<vmem>>, %arg6: memref<2x16x128xf32, #tpu.memory_space<vmem>>) attributes {dimension_semantics = [#tpu.dimension_semantics<parallel>], iteration_bounds = array<i64: 1>, scalar_prefetch = 2 : i64, scratch_operands = 0 : i64, tpu.core_type = #tpu.core_type<tc>, window_params = [{pipeline_mode = #tpu.pipeline_mode<synchronous>, transform_indices = @transform_0, window_bounds = array<i64: 2, 1, 5>}, {transform_indices = @transform_1, window_bounds = array<i64: 2, 16, 128>}, {transform_indices = @transform_2, window_bounds = array<i64: 2, 16, 128>}, {transform_indices = @transform_3, window_bounds = array<i64: 2, 16, 128>}]} {
    %0 = tpu.iota {dimensions = array<i32: 1>} : vector<1x128xi32>
    %c4_i32 = arith.constant 4 : i32
    %c0_i32 = arith.constant 0 : i32
    %1 = arith.cmpi eq, %c4_i32, %c0_i32 : i32
    %c1_i32 = arith.constant 1 : i32
    %2 = arith.select %1, %c1_i32, %c4_i32 : i32
    %3 = vector.broadcast %2 : i32 to vector<1x128xi32>
    %4 = arith.remsi %0, %3 : vector<1x128xi32>
    %c0_i32_0 = arith.constant 0 : i32
    %5 = vector.broadcast %c0_i32_0 : i32 to vector<1x128xi32>
    %6 = arith.cmpi ne, %4, %5 : vector<1x128xi32>
    %c0_i32_1 = arith.constant 0 : i32
    %7 = vector.broadcast %c0_i32_1 : i32 to vector<1x128xi32>
    %8 = arith.cmpi slt, %4, %7 : vector<1x128xi32>
    %c0_i32_2 = arith.constant 0 : i32
    %9 = arith.cmpi slt, %2, %c0_i32_2 : i32
    %10 = vector.broadcast %9 : i1 to vector<1x128xi1>
    %11 = vector.broadcast %10 : vector<1x128xi1> to vector<1x128xi1>
    %12 = arith.xori %8, %11 : vector<1x128xi1>
    %13 = arith.andi %12, %6 : vector<1x128xi1>
    %14 = vector.broadcast %2 : i32 to vector<1x128xi32>
    %15 = arith.addi %4, %14 : vector<1x128xi32>
    %16 = arith.select %13, %15, %4 : vector<1x128xi1>, vector<1x128xi32>
    %17 = tpu.iota {dimensions = array<i32: 0>} : vector<16x5xi32>
    %c2_i32 = arith.constant 2 : i32
    %18 = arith.muli %arg0, %c2_i32 : i32
    %c0_i32_3 = arith.constant 0 : i32
    %19 = arith.addi %18, %c0_i32_3 : i32
    %20 = arith.index_cast %19 : i32 to index
    %c0 = arith.constant 0 : index
    %c0_4 = arith.constant 0 : index
    %21 = vector.load %arg3[%20, %c0, %c0_4] : memref<2x1x5xi32, #tpu.memory_space<vmem>>, vector<1x1x5xi32>
    %22 = vector.shape_cast %21 : vector<1x1x5xi32> to vector<1x5xi32>
    %23 = vector.broadcast %22 : vector<1x5xi32> to vector<16x5xi32>
    %24 = arith.cmpi eq, %17, %23 : vector<16x5xi32>
    %25 = arith.extui %24 : vector<16x5xi1> to vector<16x5xi32>
    %26 = arith.sitofp %25 : vector<16x5xi32> to vector<16x5xf32>
    %cst = arith.constant dense<0xFF800000> : vector<16xf32>
    %27 = vector.multi_reduction <maximumf>, %26, %cst [1] : vector<16x5xf32> to vector<16xf32>
    %28 = vector.shape_cast %27 : vector<16xf32> to vector<16x1xf32>
    %cst_5 = arith.constant 1.000000e+00 : f32
    %29 = vector.broadcast %cst_5 : f32 to vector<16x1xf32>
    %30 = arith.subf %29, %28 : vector<16x1xf32>
    %31 = arith.index_cast %19 : i32 to index
    %32 = memref.load %arg2[%31] : memref<2xi32, #tpu.memory_space<smem>>
    %33 = vector.broadcast %32 : i32 to vector<1x128xi32>
    %34 = arith.cmpi eq, %16, %33 : vector<1x128xi32>
    %cst_6 = arith.constant 0.000000e+00 : f32
    %cst_7 = arith.constant 1.000000e+00 : f32
    %35 = vector.broadcast %cst_6 : f32 to vector<1x128xf32>
    %36 = vector.broadcast %cst_7 : f32 to vector<1x128xf32>
    %37 = arith.select %34, %35, %36 : vector<1x128xi1>, vector<1x128xf32>
    %38 = vector.shape_cast %30 : vector<16x1xf32> to vector<16x1xf32>
    %39 = vector.broadcast %38 : vector<16x1xf32> to vector<16x128xf32>
    %40 = vector.shape_cast %37 : vector<1x128xf32> to vector<1x128xf32>
    %41 = vector.broadcast %40 : vector<1x128xf32> to vector<16x128xf32>
    %c0_8 = arith.constant 0 : index
    %c0_9 = arith.constant 0 : index
    %c0_10 = arith.constant 0 : index
    %42 = vector.load %arg5[%c0_8, %c0_9, %c0_10] : memref<2x16x128xf32, #tpu.memory_space<vmem>>, vector<1x16x128xf32>
    %43 = vector.shape_cast %42 : vector<1x16x128xf32> to vector<16x128xf32>
    %44 = vector.shape_cast %39 : vector<16x128xf32> to vector<1x16x128xf32>
    tpu.vector_store %arg5[%c0_8, %c0_9, %c0_10], %44 {strides = array<i32>} : memref<2x16x128xf32, #tpu.memory_space<vmem>>, vector<1x16x128xf32>,
    %c0_11 = arith.constant 0 : index
    %c0_12 = arith.constant 0 : index
    %c0_13 = arith.constant 0 : index
    %45 = vector.load %arg6[%c0_11, %c0_12, %c0_13] : memref<2x16x128xf32, #tpu.memory_space<vmem>>, vector<1x16x128xf32>
    %46 = vector.shape_cast %45 : vector<1x16x128xf32> to vector<16x128xf32>
    %47 = vector.shape_cast %41 : vector<16x128xf32> to vector<1x16x128xf32>
    tpu.vector_store %arg6[%c0_11, %c0_12, %c0_13], %47 {strides = array<i32>} : memref<2x16x128xf32, #tpu.memory_space<vmem>>, vector<1x16x128xf32>,
    %48 = arith.maximumf %39, %41 : vector<16x128xf32>
    %c0_14 = arith.constant 0 : index
    %c0_15 = arith.constant 0 : index
    %c0_16 = arith.constant 0 : index
    %49 = vector.load %arg4[%c0_14, %c0_15, %c0_16] : memref<2x16x128xf32, #tpu.memory_space<vmem>>, vector<1x16x128xf32>
    %50 = vector.shape_cast %49 : vector<1x16x128xf32> to vector<16x128xf32>
    %51 = vector.shape_cast %48 : vector<16x128xf32> to vector<1x16x128xf32>
    tpu.vector_store %arg4[%c0_14, %c0_15, %c0_16], %51 {strides = array<i32>} : memref<2x16x128xf32, #tpu.memory_space<vmem>>, vector<1x16x128xf32>,
    %c2_i32_17 = arith.constant 2 : i32
    %52 = arith.muli %arg0, %c2_i32_17 : i32
    %c1_i32_18 = arith.constant 1 : i32
    %53 = arith.addi %52, %c1_i32_18 : i32
    %54 = arith.index_cast %53 : i32 to index
    %c0_19 = arith.constant 0 : index
    %c0_20 = arith.constant 0 : index
    %55 = vector.load %arg3[%54, %c0_19, %c0_20] : memref<2x1x5xi32, #tpu.memory_space<vmem>>, vector<1x1x5xi32>
    %56 = vector.shape_cast %55 : vector<1x1x5xi32> to vector<1x5xi32>
    %57 = vector.broadcast %56 : vector<1x5xi32> to vector<16x5xi32>
    %58 = arith.cmpi eq, %17, %57 : vector<16x5xi32>
    %59 = arith.extui %58 : vector<16x5xi1> to vector<16x5xi32>
    %60 = arith.sitofp %59 : vector<16x5xi32> to vector<16x5xf32>
    %cst_21 = arith.constant dense<0xFF800000> : vector<16xf32>
    %61 = vector.multi_reduction <maximumf>, %60, %cst_21 [1] : vector<16x5xf32> to vector<16xf32>
    %62 = vector.shape_cast %61 : vector<16xf32> to vector<16x1xf32>
    %cst_22 = arith.constant 1.000000e+00 : f32
    %63 = vector.broadcast %cst_22 : f32 to vector<16x1xf32>
    %64 = arith.subf %63, %62 : vector<16x1xf32>
    %65 = arith.index_cast %53 : i32 to index
    %66 = memref.load %arg2[%65] : memref<2xi32, #tpu.memory_space<smem>>
    %67 = vector.broadcast %66 : i32 to vector<1x128xi32>
    %68 = arith.cmpi eq, %16, %67 : vector<1x128xi32>
    %cst_23 = arith.constant 0.000000e+00 : f32
    %cst_24 = arith.constant 1.000000e+00 : f32
    %69 = vector.broadcast %cst_23 : f32 to vector<1x128xf32>
    %70 = vector.broadcast %cst_24 : f32 to vector<1x128xf32>
    %71 = arith.select %68, %69, %70 : vector<1x128xi1>, vector<1x128xf32>
    %72 = vector.shape_cast %64 : vector<16x1xf32> to vector<16x1xf32>
    %73 = vector.broadcast %72 : vector<16x1xf32> to vector<16x128xf32>
    %74 = vector.shape_cast %71 : vector<1x128xf32> to vector<1x128xf32>
    %75 = vector.broadcast %74 : vector<1x128xf32> to vector<16x128xf32>
    %c1 = arith.constant 1 : index
    %c0_25 = arith.constant 0 : index
    %c0_26 = arith.constant 0 : index
    %76 = vector.load %arg5[%c1, %c0_25, %c0_26] : memref<2x16x128xf32, #tpu.memory_space<vmem>>, vector<1x16x128xf32>
    %77 = vector.shape_cast %76 : vector<1x16x128xf32> to vector<16x128xf32>
    %78 = vector.shape_cast %73 : vector<16x128xf32> to vector<1x16x128xf32>
    tpu.vector_store %arg5[%c1, %c0_25, %c0_26], %78 {strides = array<i32>} : memref<2x16x128xf32, #tpu.memory_space<vmem>>, vector<1x16x128xf32>,
    %c1_27 = arith.constant 1 : index
    %c0_28 = arith.constant 0 : index
    %c0_29 = arith.constant 0 : index
    %79 = vector.load %arg6[%c1_27, %c0_28, %c0_29] : memref<2x16x128xf32, #tpu.memory_space<vmem>>, vector<1x16x128xf32>
    %80 = vector.shape_cast %79 : vector<1x16x128xf32> to vector<16x128xf32>
    %81 = vector.shape_cast %75 : vector<16x128xf32> to vector<1x16x128xf32>
    tpu.vector_store %arg6[%c1_27, %c0_28, %c0_29], %81 {strides = array<i32>} : memref<2x16x128xf32, #tpu.memory_space<vmem>>, vector<1x16x128xf32>,
    %82 = arith.maximumf %73, %75 : vector<16x128xf32>
    %c1_30 = arith.constant 1 : index
    %c0_31 = arith.constant 0 : index
    %c0_32 = arith.constant 0 : index
    %83 = vector.load %arg4[%c1_30, %c0_31, %c0_32] : memref<2x16x128xf32, #tpu.memory_space<vmem>>, vector<1x16x128xf32>
    %84 = vector.shape_cast %83 : vector<1x16x128xf32> to vector<16x128xf32>
    %85 = vector.shape_cast %82 : vector<16x128xf32> to vector<1x16x128xf32>
    tpu.vector_store %arg4[%c1_30, %c0_31, %c0_32], %85 {strides = array<i32>} : memref<2x16x128xf32, #tpu.memory_space<vmem>>, vector<1x16x128xf32>,
    return
  }
  func.func @transform_0(%arg0: i32, %arg1: memref<10xi32, #tpu.memory_space<smem>>, %arg2: memref<2xi32, #tpu.memory_space<smem>>) -> (i32, i32, i32) {
    %c0_i32 = arith.constant 0 : i32
    %c0_i32_0 = arith.constant 0 : i32
    %c0_i32_1 = arith.constant 0 : i32
    %c0_i32_2 = arith.constant 0 : i32
    return %c0_i32, %c0_i32_0, %c0_i32_1 : i32, i32, i32
  }
  func.func @transform_1(%arg0: i32, %arg1: memref<10xi32, #tpu.memory_space<smem>>, %arg2: memref<2xi32, #tpu.memory_space<smem>>) -> (i32, i32, i32) {
    %c0_i32 = arith.constant 0 : i32
    %c0_i32_0 = arith.constant 0 : i32
    %c0_i32_1 = arith.constant 0 : i32
    return %arg0, %c0_i32, %c0_i32_0 : i32, i32, i32
  }
  func.func @transform_2(%arg0: i32, %arg1: memref<10xi32, #tpu.memory_space<smem>>, %arg2: memref<2xi32, #tpu.memory_space<smem>>) -> (i32, i32, i32) {
    %c0_i32 = arith.constant 0 : i32
    %c0_i32_0 = arith.constant 0 : i32
    %c0_i32_1 = arith.constant 0 : i32
    return %arg0, %c0_i32, %c0_i32_0 : i32, i32, i32
  }
  func.func @transform_3(%arg0: i32, %arg1: memref<10xi32, #tpu.memory_space<smem>>, %arg2: memref<2xi32, #tpu.memory_space<smem>>) -> (i32, i32, i32) {
    %c0_i32 = arith.constant 0 : i32
    %c0_i32_0 = arith.constant 0 : i32
    %c0_i32_1 = arith.constant 0 : i32
    return %arg0, %c0_i32, %c0_i32_0 : i32, i32, i32
  }
}

</mosaic_0001>

<bundles_post_ra>
// kernel: tpu_custom_call.1
= control target key start
LH: loop header
LB: loop body
LE: loop exit
PB: predicated region body
PF: predicated region fallthrough
CT: control target
= control target key end

     0   :  { %s327_s24 = smov [#allocation3]   ;;  %s328_s25 = smov [#allocation4]   ;;  %s394_s0 = inlined_call_operand.hbm [shape: s32[10], index: 0, kind: input, shape index: {}]   ;;  %s395_s2 = inlined_call_operand.hbm [shape: s32[2,1,5], index: 2, kind: input, shape index: {}]   ;;  %s396_s3 = inlined_call_operand.hbm [shape: f32[2,16,128], index: 3, kind: output, shape index: {0}]   ;;  %s397_s4 = inlined_call_operand.hbm [shape: f32[2,16,128], index: 4, kind: output, shape index: {1}]   ;;  %s398_s5 = inlined_call_operand.hbm [shape: f32[2,16,128], index: 5, kind: output, shape index: {2}]   ;;  %s399_s1 = inlined_call_operand.hbm [shape: s32[2], index: 1, kind: input, shape index: {}]  }
   0x1   :  { %s12_s20 = sshll.u32 %s394_s0, 4  ;;  %s17_s23 = sshll.u32 %s399_s1, 4  ;;  %s13_s20 = int_to_ptr.hbm [resolvable:$true] %s12_s20  ;;  %s18_s23 = int_to_ptr.hbm [resolvable:$true] %s17_s23 }
   0x2   :  { %15 = dma.hbm_to_smem %s13_s20, 16, %s327_s24, [#allocation2] }
   0x3   :  { %20 = dma.hbm_to_smem %s18_s23, 16, %s328_s25, [#allocation2] }
   0x4   :  { %319 = dma.done.wait [#allocation2], 32 }
   0x5   :  { %320 = vsyncadd [#allocation2], 4294967264 }
   0x6   :  { %23 = sfence }
   0x7   :  { %24 = vsyncpa [#allocation6], 0 }
   0x8   :  { %25 = vsyncpa [#allocation7], 0 }
   0x9   :  { %26 = vsyncpa [#allocation10], 0  ;;  %s31_s0 = sshll.u32 %s395_s2, 4  ;;  %s329_s28 = smov [#allocation5]   ;;  %s32_s0 = int_to_ptr.hbm [resolvable:$true] %s31_s0 }
   0xa   :  { %s33_s29 = sshll.u32 %s329_s28, 4  ;;  %s330_s1 = smov 16   ;;  %s34_s29 = int_to_ptr.vmem [resolvable:$true] %s33_s29 }
   0xb   :  { %s331_s30 = smov 1  }
   0xc   :  { %39 = dma.hbm_to_vmem [thread:$0]  %s32_s0, 32, %s34_s29, [#allocation6], %s330_s1, %s330_s1, %s331_s30  }
   0xd   :  { %321 = dma.done.wait [#allocation6], 32  }
   0xe   :  { %322 = vsyncadd [#allocation6], 4294967264  ;;  %v44_v0 = vlaneseq  ;;  %s184_s6 = sld [smem:[#allocation4 + $0x1]]  ;;  %v197_v5 = vld [vmem:[#allocation5 + $0x1] ss:$0 sm:$0xff]  ;;  %vm71_vm0 = vcmask 39936  }
   0xf   :  { %v198_v7 = vld [vmem:[#allocation5] ss:$0 sm:$0xff]  ;;  %v332_v8 = vmov 1.0   ;;  %v333_v10 = vmov 0.0   ;;  %s80_s2 = sld [smem:[#allocation4]]  ;;  %s334_s7 = smov [#allocation9]  }
  0x10   :  { %v45_v1 = vand.u32 127, %v44_v0  ;;  %v59_v2 = vshrl.u32 %v44_v0, 7  ;;  %s382_s8 = sshll.u32 %s334_s7, 4  ;;  %s144_s11 = sshll.u32 %s397_s4, 4  ;;  %s143_s8 = int_to_ptr.vmem [resolvable:$true] %s382_s8  ;;  %s145_s11 = int_to_ptr.hbm [resolvable:$true] %s144_s11 }
  0x11   :  { %s335_s12 = smov [#allocation11]   ;;  %s157_s16 = sshll.u32 %s398_s5, 4  ;;  %s158_s16 = int_to_ptr.hbm [resolvable:$true] %s157_s16 }
  0x12   :  { %v50_v3 = vand.u32 3, %v45_v1  ;;  %v60_v4 = vadd.s32 8, %v59_v2  ;;  %vm96_vm2 = vcmp.eq.s32.totalorder %v59_v2, %v197_v5  ;;  %vm65_vm3 = vcmp.eq.s32.totalorder %v59_v2, %v198_v7  ;;  %s155_s13 = sshll.u32 %s335_s12, 4  ;;  %s336_s17 = smov [#allocation8]   ;;  %s156_s13 = int_to_ptr.vmem [resolvable:$true] %s155_s13 }
  0x13   :  { %v182_v11 = vsel %vm96_vm2, 1.0, %v333_v10  ;;  %v180_v13 = vsel %vm65_vm3, 1.0, %v333_v10  ;;  %s129_s18 = sshll.u32 %s336_s17, 4  ;;  %s131_s21 = sshll.u32 %s396_s3, 4  ;;  %s130_s18 = int_to_ptr.vmem [resolvable:$true] %s129_s18  ;;  %s132_s21 = int_to_ptr.hbm [resolvable:$true] %s131_s21 }
  0x14   :  { %v111_v6 = vstv %s184_s6  ;;  %v102_v12 = vsel %vm71_vm0, %v182_v11, -inf  ;;  %vm97_vm4 = vcmp.eq.s32.totalorder %v60_v4, %v197_v5  ;;  %v72_v14 = vsel %vm71_vm0, %v180_v13, -inf  ;;  %s337_s4 = smov 128   ;;  %s338_s5 = smov 8  }
  0x15   :  { %vm112_vm1 = vcmp.eq.s32.totalorder %v50_v3, %v111_v6  ;;  %103 = vmax.xlane.f32.xlu1 %v102_v12  ;;  %vm66_vm5 = vcmp.eq.s32.totalorder %v60_v4, %v198_v7  ;;  %73 = vmax.xlane.f32.xlu0 %v72_v14  ;;  %v183_v15 = vsel %vm97_vm4, 1.0, %v333_v10  ;;  %v81_v19 = vstv %s80_s2 }
  0x16   :  { %v113_v9 = vsel %vm112_vm1, 0.0, %v332_v8  ;;  %v181_v16 = vsel %vm66_vm5, 1.0, %v333_v10  ;;  %v105_v17 = vsel %vm71_vm0, %v183_v15, -inf  ;;  %vm82_vm6 = vcmp.eq.s32.totalorder %v50_v3, %v81_v19 }
  0x17   :  { %118 = vst [vmem:[#allocation11 + $0x10] sm:$0xff] %v113_v9  ;;  %v75_v18 = vsel %vm71_vm0, %v181_v16, -inf  ;;  %v83_v20 = vsel %vm82_vm6, 0.0, %v332_v8 }
  0x18   :  { %119 = vst [vmem:[#allocation11 + $0x18] sm:$0xff] %v113_v9 }
  0x19   :  { %86 = vst [vmem:[#allocation11] sm:$0xff] %v83_v20 }
  0x1a   :  { %87 = vst [vmem:[#allocation11 + $0x8] sm:$0xff] %v83_v20 }
  0x1d   :  { %106 = vmax.xlane.f32.xlu1 %v105_v17  ;;  %76 = vmax.xlane.f32.xlu0 %v75_v18 }
  0x88   :  { %v104_v21 = vpop.xlane.xlu1 %103  ;;  %v74_v23 = vpop.xlane.xlu0 %73 }
  0x89   :  { %v108_v22 = vsub.f32 1.0, %v104_v21  ;;  %v78_v24 = vsub.f32 1.0, %v74_v23 }
  0x8b   :  { %115 = vst [vmem:[#allocation9 + $0x10] sm:$0xff] %v108_v22  ;;  %v120_v25 = vmax.f32 %v108_v22, %v113_v9  ;;  %v88_v26 = vmax.f32 %v78_v24, %v83_v20 }
  0x8c   :  { %84 = vst [vmem:[#allocation9] sm:$0xff] %v78_v24 }
  0x8d   :  { %123 = vst [vmem:[#allocation8 + $0x10] sm:$0xff] %v120_v25 }
  0x8e   :  { %90 = vst [vmem:[#allocation8] sm:$0xff] %v88_v26 }
  0x90   :  { %v107_v27 = vpop.xlane.xlu1 %106  ;;  %v77_v29 = vpop.xlane.xlu0 %76 }
  0x91   :  { %v109_v28 = vsub.f32 1.0, %v107_v27  ;;  %v79_v30 = vsub.f32 1.0, %v77_v29 }
  0x93   :  { %116 = vst [vmem:[#allocation9 + $0x18] sm:$0xff] %v109_v28  ;;  %v121_v31 = vmax.f32 %v109_v28, %v113_v9  ;;  %v89_v32 = vmax.f32 %v79_v30, %v83_v20 }
  0x94   :  { %85 = vst [vmem:[#allocation9 + $0x8] sm:$0xff] %v79_v30 }
  0x95   :  { %124 = vst [vmem:[#allocation8 + $0x18] sm:$0xff] %v121_v31  ;;  %150 = dma.vmem_to_hbm [thread:$0]  %s143_s8, 512, %s145_s11, [#allocation10], %s337_s4, %s337_s4, %s338_s5  }
  0x96   :  { %91 = vst [vmem:[#allocation8 + $0x8] sm:$0xff] %v89_v32  ;;  %163 = dma.vmem_to_hbm [thread:$0]  %s156_s13, 512, %s158_s16, [#allocation10], %s337_s4, %s337_s4, %s338_s5  }
  0x97   :  { %137 = dma.vmem_to_hbm [thread:$0]  %s130_s18, 512, %s132_s21, [#allocation7], %s337_s4, %s337_s4, %s338_s5  }
  0x98   :  { %323 = dma.done.wait [#allocation7], 512  }
  0x99   :  { %324 = vsyncadd [#allocation7], 4294966784 }
  0x9a   :  { %325 = dma.done.wait [#allocation10], 1024  }
  0x9b   :  { %326 = vsyncadd [#allocation10], 4294966272 }
  0x9c   :  { %176 = vsyncpa [#allocation6], 1 }
  0x9d   :  { %177 = vsyncpa [#allocation7], 1 }
  0x9e   :  { %178 = vsyncpa [#allocation10], 1 }

</bundles_post_ra>
